<compile_context>
chip_gen: v7x
topology: tpu7x:2x2x1
jax: 0.10.0
libtpu: 0.0.40
codegen_flags: <defaults>
</compile_context>

<pallas_src>
import functools

import jax
import jax.numpy as jnp
from jax.experimental import pallas as pl
from jax.experimental.pallas import tpu as pltpu


def _make_sharesep_weight(kernel_size: int, dtype=jnp.float32) -> jnp.ndarray:
    """Deterministic init identical to the PyTorch module: zeros with a 1 at the center."""
    assert kernel_size % 2 == 1, "kernel size should be odd"
    w = jnp.zeros((kernel_size, kernel_size), dtype=dtype)
    c = (kernel_size - 1) // 2
    return w.at[c, c].set(1.0)


def _sharesep_kernel(w_ref, x_ref, o_ref, xp_ref, *, kernel_size: int, pad: int,
                     H: int, W: int):
    # w_ref : (k*k,)              SMEM  (shared filter, flat layout)
    # x_ref : (H, W, Cb)          VMEM  (unpadded channels-last block; Cb on the lane axis)
    # o_ref : (H, W, Cb)          VMEM
    # xp_ref: (H+2p, W+2p, Cb)    VMEM scratch (zero halo + current block interior)

    # Hoist the k*k shared scalars once (static SMEM reads).
    taps = [w_ref[t] for t in range(kernel_size * kernel_size)]

    # Build the zero-haloed block entirely in VMEM (no HBM padding pass). Re-zero every
    # step so correctness does not depend on how the parallel grid is sharded over cores.
    xp_ref[...] = jnp.zeros_like(xp_ref)
    xp_ref[pad:pad + H, pad:pad + W, :] = x_ref[...].astype(jnp.float32)

    acc = jnp.zeros(o_ref.shape, jnp.float32)
    for i in range(kernel_size):          # static, fully unrolled k*k taps
        for j in range(kernel_size):
            # i shifts the untiled leading dim (free), j the sublane dim (cheap);
            # the dense lane axis (channels) is untouched.
            acc = acc + taps[i * kernel_size + j] * xp_ref[i:i + H, j:j + W, :]
    o_ref[...] = acc.astype(o_ref.dtype)


def _choose_channel_block(nc: int, hp: int, wp: int, itemsize: int) -> int:
    """Pick the lane block along the flattened N*C axis: a multiple of 128 that divides
    nc and keeps the padded input block <= ~2 MiB (comfortable for v7x's 64 MiB VMEM with
    double buffering). Falls back to the full dim when nc is not a multiple of 128
    (always a legal block size)."""
    LANE = 128
    if nc % LANE != 0:
        return nc
    budget = 2 << 20  # ~2 MiB per padded input block
    best = LANE
    cb = LANE
    while cb <= nc:
        if nc % cb == 0 and hp * wp * cb * itemsize <= budget:
            best = cb
        cb += LANE
    # Prefer >= 2 grid steps so both v7x TensorCores get work on the parallel axis.
    if best == nc and nc >= 2 * LANE and (nc // 2) % LANE == 0:
        best = nc // 2
    return best


def share_sep_conv(x: jnp.ndarray, weight: jnp.ndarray, kernel_size: int) -> jnp.ndarray:
    """x: (N, C, H, W); weight: (k, k). Same semantics as
    F.conv2d(x, weight.expand(C,1,k,k), None, stride=1, padding=(k-1)//2, dilation=1, groups=C)."""
    assert kernel_size % 2 == 1
    pad = (kernel_size - 1) // 2
    N, C, H, W = x.shape
    NC = N * C
    Hp, Wp = H + 2 * pad, W + 2 * pad

    # Channels-last, lane-dense layout: (H, W, N*C). Layout plumbing only (no compute).
    x_cl = jnp.transpose(x.reshape(NC, H, W), (1, 2, 0))

    Cb = _choose_channel_block(NC, Hp, Wp, x.dtype.itemsize)
    grid = (NC // Cb,)

    w_flat = weight.reshape(kernel_size * kernel_size).astype(jnp.float32)

    kernel = functools.partial(
        _sharesep_kernel, kernel_size=kernel_size, pad=pad, H=H, W=W)

    out_cl = pl.pallas_call(
        kernel,
        out_shape=jax.ShapeDtypeStruct((H, W, NC), x.dtype),
        grid_spec=pltpu.PrefetchScalarGridSpec(
            num_scalar_prefetch=0,
            grid=grid,
            in_specs=[
                pl.BlockSpec(memory_space=pltpu.MemorySpace.SMEM),   # flat (k*k,) weight
                pl.BlockSpec((H, W, Cb), lambda c: (0, 0, c)),       # channel block of images
            ],
            out_specs=pl.BlockSpec((H, W, Cb), lambda c: (0, 0, c)),
            scratch_shapes=[pltpu.VMEM((Hp, Wp, Cb), jnp.float32)],  # zero-haloed block
        ),
        compiler_params=pltpu.CompilerParams(
            dimension_semantics=("parallel",),
        ),
    )(w_flat, x_cl)

    # Back to NCHW.
    return jnp.transpose(out_cl, (2, 0, 1)).reshape(N, C, H, W)


def _reference(x, weight, kernel_size):
    """Pure-JAX reference: depthwise conv with a shared weight."""
    N, C, H, W = x.shape
    w = jnp.broadcast_to(weight[None, None, :, :], (C, 1, kernel_size, kernel_size))
    pad = (kernel_size - 1) // 2
    return jax.lax.conv_general_dilated(
        x, w,
        window_strides=(1, 1),
        padding=((pad, pad), (pad, pad)),
        dimension_numbers=("NCHW", "OIHW", "NCHW"),
        feature_group_count=C,
    )


if __name__ == "__main__":
    kernel_size = 3

    # Deterministic weight: module init (delta at center) plus a small deterministic
    # perturbation so the conv actually mixes neighbors.
    weight = _make_sharesep_weight(kernel_size)
    weight = weight + 0.1 * jax.random.normal(
        jax.random.PRNGKey(1), (kernel_size, kernel_size), dtype=jnp.float32)

    # Primary test at the spec'd small shape.
    N, C, H, W = 2, 4, 16, 16
    x = jax.random.normal(jax.random.PRNGKey(0), (N, C, H, W), dtype=jnp.float32)
    out = jax.block_until_ready(share_sep_conv(x, weight, kernel_size))
    ref = _reference(x, weight, kernel_size)
    assert out.shape == (N, C, H, W)
    assert jnp.allclose(out, ref, atol=1e-5, rtol=1e-5), "mismatch vs reference conv"

    # Secondary sanity check exercising the multi-block (multi-step grid) path:
    # N*C = 256 -> 128-wide lane blocks, 2 grid steps.
    N2, C2 = 2, 128
    x2 = jax.random.normal(jax.random.PRNGKey(2), (N2, C2, H, W), dtype=jnp.float32)
    out2 = jax.block_until_ready(share_sep_conv(x2, weight, kernel_size))
    ref2 = _reference(x2, weight, kernel_size)
    assert jnp.allclose(out2, ref2, atol=1e-5, rtol=1e-5), "mismatch vs reference conv (multi-block)"

    print("KERNEL_OK")
</pallas_src>

<mosaic_0001>
module attributes {stable_mosaic.version = 11 : i64} {
  func.func @_sharesep_kernel(%arg0: i32, %arg1: memref<9xf32, #tpu.memory_space<smem>>, %arg2: memref<16x16x8xf32, #tpu.memory_space<vmem>>, %arg3: memref<16x16x8xf32, #tpu.memory_space<vmem>>, %arg4: memref<18x18x8xf32, #tpu.memory_space<vmem>>) attributes {dimension_semantics = [#tpu.dimension_semantics<parallel>], iteration_bounds = array<i64: 1>, scalar_prefetch = 0 : i64, scratch_operands = 1 : i64, tpu.core_type = #tpu.core_type<tc>, window_params = [{transform_indices = @transform_0, window_bounds = array<i64: 9>}, {transform_indices = @transform_1, window_bounds = array<i64: 16, 16, 8>}, {transform_indices = @transform_2, window_bounds = array<i64: 16, 16, 8>}]} {
    %c0 = arith.constant 0 : index
    %0 = memref.load %arg1[%c0] : memref<9xf32, #tpu.memory_space<smem>>
    %c1 = arith.constant 1 : index
    %1 = memref.load %arg1[%c1] : memref<9xf32, #tpu.memory_space<smem>>
    %c2 = arith.constant 2 : index
    %2 = memref.load %arg1[%c2] : memref<9xf32, #tpu.memory_space<smem>>
    %c3 = arith.constant 3 : index
    %3 = memref.load %arg1[%c3] : memref<9xf32, #tpu.memory_space<smem>>
    %c4 = arith.constant 4 : index
    %4 = memref.load %arg1[%c4] : memref<9xf32, #tpu.memory_space<smem>>
    %c5 = arith.constant 5 : index
    %5 = memref.load %arg1[%c5] : memref<9xf32, #tpu.memory_space<smem>>
    %c6 = arith.constant 6 : index
    %6 = memref.load %arg1[%c6] : memref<9xf32, #tpu.memory_space<smem>>
    %c7 = arith.constant 7 : index
    %7 = memref.load %arg1[%c7] : memref<9xf32, #tpu.memory_space<smem>>
    %c8 = arith.constant 8 : index
    %8 = memref.load %arg1[%c8] : memref<9xf32, #tpu.memory_space<smem>>
    %cst = arith.constant 0.000000e+00 : f32
    %9 = vector.broadcast %cst : f32 to vector<18x18x8xf32>
    %c0_0 = arith.constant 0 : index
    %c0_1 = arith.constant 0 : index
    %c0_2 = arith.constant 0 : index
    %10 = vector.load %arg4[%c0_0, %c0_1, %c0_2] : memref<18x18x8xf32, #tpu.memory_space<vmem>>, vector<18x18x8xf32>
    tpu.vector_store %arg4[%c0_0, %c0_1, %c0_2], %9 {strides = array<i32>} : memref<18x18x8xf32, #tpu.memory_space<vmem>>, vector<18x18x8xf32>,
    %c0_3 = arith.constant 0 : index
    %c0_4 = arith.constant 0 : index
    %c0_5 = arith.constant 0 : index
    %11 = vector.load %arg2[%c0_3, %c0_4, %c0_5] : memref<16x16x8xf32, #tpu.memory_space<vmem>>, vector<16x16x8xf32>
    %c1_6 = arith.constant 1 : index
    %c1_7 = arith.constant 1 : index
    %c0_8 = arith.constant 0 : index
    %12 = vector.load %arg4[%c1_6, %c1_7, %c0_8] : memref<18x18x8xf32, #tpu.memory_space<vmem>>, vector<16x16x8xf32>
    tpu.vector_store %arg4[%c1_6, %c1_7, %c0_8], %11 {strides = array<i32>} : memref<18x18x8xf32, #tpu.memory_space<vmem>>, vector<16x16x8xf32>,
    %cst_9 = arith.constant 0.000000e+00 : f32
    %13 = vector.broadcast %cst_9 : f32 to vector<16x16x8xf32>
    %c0_10 = arith.constant 0 : index
    %c0_11 = arith.constant 0 : index
    %c0_12 = arith.constant 0 : index
    %14 = vector.load %arg4[%c0_10, %c0_11, %c0_12] : memref<18x18x8xf32, #tpu.memory_space<vmem>>, vector<16x16x8xf32>
    %15 = vector.broadcast %0 : f32 to vector<16x16x8xf32>
    %16 = arith.mulf %15, %14 : vector<16x16x8xf32>
    %17 = arith.addf %13, %16 : vector<16x16x8xf32>
    %c0_13 = arith.constant 0 : index
    %c1_14 = arith.constant 1 : index
    %c0_15 = arith.constant 0 : index
    %18 = vector.load %arg4[%c0_13, %c1_14, %c0_15] : memref<18x18x8xf32, #tpu.memory_space<vmem>>, vector<16x16x8xf32>
    %19 = vector.broadcast %1 : f32 to vector<16x16x8xf32>
    %20 = arith.mulf %19, %18 : vector<16x16x8xf32>
    %21 = arith.addf %17, %20 : vector<16x16x8xf32>
    %c0_16 = arith.constant 0 : index
    %c2_17 = arith.constant 2 : index
    %c0_18 = arith.constant 0 : index
    %22 = vector.load %arg4[%c0_16, %c2_17, %c0_18] : memref<18x18x8xf32, #tpu.memory_space<vmem>>, vector<16x16x8xf32>
    %23 = vector.broadcast %2 : f32 to vector<16x16x8xf32>
    %24 = arith.mulf %23, %22 : vector<16x16x8xf32>
    %25 = arith.addf %21, %24 : vector<16x16x8xf32>
    %c1_19 = arith.constant 1 : index
    %c0_20 = arith.constant 0 : index
    %c0_21 = arith.constant 0 : index
    %26 = vector.load %arg4[%c1_19, %c0_20, %c0_21] : memref<18x18x8xf32, #tpu.memory_space<vmem>>, vector<16x16x8xf32>
    %27 = vector.broadcast %3 : f32 to vector<16x16x8xf32>
    %28 = arith.mulf %27, %26 : vector<16x16x8xf32>
    %29 = arith.addf %25, %28 : vector<16x16x8xf32>
    %c1_22 = arith.constant 1 : index
    %c1_23 = arith.constant 1 : index
    %c0_24 = arith.constant 0 : index
    %30 = vector.load %arg4[%c1_22, %c1_23, %c0_24] : memref<18x18x8xf32, #tpu.memory_space<vmem>>, vector<16x16x8xf32>
    %31 = vector.broadcast %4 : f32 to vector<16x16x8xf32>
    %32 = arith.mulf %31, %30 : vector<16x16x8xf32>
    %33 = arith.addf %29, %32 : vector<16x16x8xf32>
    %c1_25 = arith.constant 1 : index
    %c2_26 = arith.constant 2 : index
    %c0_27 = arith.constant 0 : index
    %34 = vector.load %arg4[%c1_25, %c2_26, %c0_27] : memref<18x18x8xf32, #tpu.memory_space<vmem>>, vector<16x16x8xf32>
    %35 = vector.broadcast %5 : f32 to vector<16x16x8xf32>
    %36 = arith.mulf %35, %34 : vector<16x16x8xf32>
    %37 = arith.addf %33, %36 : vector<16x16x8xf32>
    %c2_28 = arith.constant 2 : index
    %c0_29 = arith.constant 0 : index
    %c0_30 = arith.constant 0 : index
    %38 = vector.load %arg4[%c2_28, %c0_29, %c0_30] : memref<18x18x8xf32, #tpu.memory_space<vmem>>, vector<16x16x8xf32>
    %39 = vector.broadcast %6 : f32 to vector<16x16x8xf32>
    %40 = arith.mulf %39, %38 : vector<16x16x8xf32>
    %41 = arith.addf %37, %40 : vector<16x16x8xf32>
    %c2_31 = arith.constant 2 : index
    %c1_32 = arith.constant 1 : index
    %c0_33 = arith.constant 0 : index
    %42 = vector.load %arg4[%c2_31, %c1_32, %c0_33] : memref<18x18x8xf32, #tpu.memory_space<vmem>>, vector<16x16x8xf32>
    %43 = vector.broadcast %7 : f32 to vector<16x16x8xf32>
    %44 = arith.mulf %43, %42 : vector<16x16x8xf32>
    %45 = arith.addf %41, %44 : vector<16x16x8xf32>
    %c2_34 = arith.constant 2 : index
    %c2_35 = arith.constant 2 : index
    %c0_36 = arith.constant 0 : index
    %46 = vector.load %arg4[%c2_34, %c2_35, %c0_36] : memref<18x18x8xf32, #tpu.memory_space<vmem>>, vector<16x16x8xf32>
    %47 = vector.broadcast %8 : f32 to vector<16x16x8xf32>
    %48 = arith.mulf %47, %46 : vector<16x16x8xf32>
    %49 = arith.addf %45, %48 : vector<16x16x8xf32>
    %c0_37 = arith.constant 0 : index
    %c0_38 = arith.constant 0 : index
    %c0_39 = arith.constant 0 : index
    %50 = vector.load %arg3[%c0_37, %c0_38, %c0_39] : memref<16x16x8xf32, #tpu.memory_space<vmem>>, vector<16x16x8xf32>
    tpu.vector_store %arg3[%c0_37, %c0_38, %c0_39], %49 {strides = array<i32>} : memref<16x16x8xf32, #tpu.memory_space<vmem>>, vector<16x16x8xf32>,
    return
  }
  func.func @transform_0(%arg0: i32) -> i32 {
    %c0_i32 = arith.constant 0 : i32
    %c0_i32_0 = arith.constant 0 : i32
    return %c0_i32 : i32
  }
  func.func @transform_1(%arg0: i32) -> (i32, i32, i32) {
    %c0_i32 = arith.constant 0 : i32
    %c0_i32_0 = arith.constant 0 : i32
    %c0_i32_1 = arith.constant 0 : i32
    return %c0_i32, %c0_i32_0, %arg0 : i32, i32, i32
  }
  func.func @transform_2(%arg0: i32) -> (i32, i32, i32) {
    %c0_i32 = arith.constant 0 : i32
    %c0_i32_0 = arith.constant 0 : i32
    %c0_i32_1 = arith.constant 0 : i32
    return %c0_i32, %c0_i32_0, %arg0 : i32, i32, i32
  }
}

</mosaic_0001>

<bundles_post_ra>
// kernel: tpu_custom_call.1
= control target key start
LH: loop header
LB: loop body
LE: loop exit
PB: predicated region body
PF: predicated region fallthrough
CT: control target
= control target key end

     0   :  { %7 = vsyncpa [#allocation4], 0  ;;  %s1807_s0 = inlined_call_operand.vmem [shape: f32[9], index: 0, kind: input, shape index: {}]   ;;  %s1808_s1 = inlined_call_operand.vmem [shape: f32[16,16,8], index: 1, kind: input, shape index: {}]   ;;  %s1809_s2 = inlined_call_operand.vmem [shape: f32[16,16,8], index: 2, kind: output, shape index: {}]  }
   0x1   :  { %s14_s11 = sshll.u32 %s1807_s0, 4  ;;  %s15_s11 = int_to_ptr.vmem [resolvable:$true] %s14_s11 }
   0x2   :  { %s1075_s12 = scalar_lea.vmem %s15_s11, 16  ;;  %p1080_p1 = scmp.lt.s32.totalorder %s15_s11, %s15_s11 }
   0x3   :  { %p1076_p0 = scmp.ne.s32.totalorder %s15_s11, %s1075_s12  ;;  %p1081_p2 = scmp.lt.s32.totalorder %s1075_s12, %s1075_s12 }
   0x5   :  { %p1082_p3 = por %p1081_p2, %p1080_p1 }
   0x7   :  { %p1083_p4 = pnand %p1082_p3, %p1076_p0 }
   0x9   :  { %1086 = shalt.err (!%p1083_p4)
}
   0xa   :  { %s1089_s13 = smov [#allocation3]  }
   0xb   :  { %17 = dma.vmem_to_smem %s15_s11, 16, %s1089_s13, [#allocation4]  }
   0xc   :  { %1087 = dma.done.wait [#allocation4], 16  }
   0xd   :  { %1088 = vsyncadd [#allocation4], 4294967280 }
   0xe   :  { %23 = sfence }
   0xf   :  { %vm33_vm0 = vcmask 64512   ;;  %vm36_vm1 = vcmask 58368   ;;  %v89_v0 = vld [vmem:[%s1808_s1] sm:$0xff]  ;;  %v90_v1 = vld [vmem:[%s1808_s1 + $0x8] sm:$0xff]  ;;  %v91_v2 = vld [vmem:[%s1808_s1 + $0x10] sm:$0xff]  ;;  %v1090_v3 = vmov 0.0  }
  0x10   :  { %34 = vst.msk [vmem:[#allocation2] sm:$0xff] %vm33_vm0, %v1090_v3  ;;  %35 = vst.msk [vmem:[#allocation2 + $0x8] sm:$0xff] %vm33_vm0, %v1090_v3  ;;  %v92_v4 = vld [vmem:[%s1808_s1 + $0x18] sm:$0xff]  ;;  %v93_v5 = vld [vmem:[%s1808_s1 + $0x20] sm:$0xff]  ;;  %s1181_s25 = sld [smem:[#allocation3]]  ;;  %s1198_s4 = sld [smem:[#allocation3 + $0x1]] }
  0x11   :  { %38 = vst.msk [vmem:[#allocation2 + $0x18] sm:$0xff] %vm33_vm0, %v1090_v3  ;;  %39 = vst.msk [vmem:[#allocation2 + $0x20] sm:$0xff] %vm33_vm0, %v1090_v3  ;;  %v94_v6 = vld [vmem:[%s1808_s1 + $0x28] sm:$0xff]  ;;  %v95_v7 = vld [vmem:[%s1808_s1 + $0x30] sm:$0xff]  ;;  %s1212_s11 = sld [smem:[#allocation3 + $0x2]]  ;;  %s1226_s17 = sld [smem:[#allocation3 + $0x3]] }
  0x12   :  { %41 = vst.msk [vmem:[#allocation2 + $0x30] sm:$0xff] %vm33_vm0, %v1090_v3  ;;  %42 = vst.msk [vmem:[#allocation2 + $0x38] sm:$0xff] %vm33_vm0, %v1090_v3  ;;  %v96_v8 = vld [vmem:[%s1808_s1 + $0x38] sm:$0xff]  ;;  %v97_v9 = vld [vmem:[%s1808_s1 + $0x40] sm:$0xff]  ;;  %s1240_s24 = sld [smem:[#allocation3 + $0x4]]  ;;  %s1254_s5 = sld [smem:[#allocation3 + $0x5]] }
  0x13   :  { %44 = vst.msk [vmem:[#allocation2 + $0x48] sm:$0xff] %vm33_vm0, %v1090_v3  ;;  %45 = vst.msk [vmem:[#allocation2 + $0x50] sm:$0xff] %vm33_vm0, %v1090_v3  ;;  %v98_v10 = vld [vmem:[%s1808_s1 + $0x48] sm:$0xff]  ;;  %v99_v11 = vld [vmem:[%s1808_s1 + $0x50] sm:$0xff]  ;;  %s1268_s13 = sld [smem:[#allocation3 + $0x6]] }
  0x14   :  { %47 = vst.msk [vmem:[#allocation2 + $0x60] sm:$0xff] %vm33_vm0, %v1090_v3  ;;  %48 = vst.msk [vmem:[#allocation2 + $0x68] sm:$0xff] %vm33_vm0, %v1090_v3  ;;  %v100_v12 = vld [vmem:[%s1808_s1 + $0x58] sm:$0xff]  ;;  %v101_v13 = vld [vmem:[%s1808_s1 + $0x60] sm:$0xff] }
  0x15   :  { %50 = vst.msk [vmem:[#allocation2 + $0x78] sm:$0xff] %vm33_vm0, %v1090_v3  ;;  %51 = vst.msk [vmem:[#allocation2 + $0x80] sm:$0xff] %vm33_vm0, %v1090_v3  ;;  %v102_v14 = vld [vmem:[%s1808_s1 + $0x68] sm:$0xff]  ;;  %v103_v15 = vld [vmem:[%s1808_s1 + $0x70] sm:$0xff] }
  0x16   :  { %53 = vst.msk [vmem:[#allocation2 + $0x90] sm:$0xff] %vm33_vm0, %v1090_v3  ;;  %54 = vst.msk [vmem:[#allocation2 + $0x98] sm:$0xff] %vm33_vm0, %v1090_v3  ;;  %v104_v16 = vld [vmem:[%s1808_s1 + $0x78] sm:$0xff]  ;;  %v105_v17 = vld [vmem:[%s1808_s1 + $0x80] sm:$0xff]  ;;  %v1271_v25 = vstv %s1181_s25  ;;  %s1285_s25 = sld [smem:[#allocation3 + $0x7]]  ;;  %v1288_v29 = vstv %s1198_s4  ;;  %s1302_s4 = sld [smem:[#allocation3 + $0x8]] }
  0x17   :  { %56 = vst.msk [vmem:[#allocation2 + $0xa8] sm:$0xff] %vm33_vm0, %v1090_v3  ;;  %57 = vst.msk [vmem:[#allocation2 + $0xb0] sm:$0xff] %vm33_vm0, %v1090_v3  ;;  %v106_v18 = vld [vmem:[%s1808_s1 + $0x88] sm:$0xff]  ;;  %v107_v19 = vld [vmem:[%s1808_s1 + $0x90] sm:$0xff]  ;;  %v1305_v33 = vstv %s1212_s11  ;;  %v1322_v43 = vstv %s1226_s17 }
  0x18   :  { %59 = vst.msk [vmem:[#allocation2 + $0xc0] sm:$0xff] %vm33_vm0, %v1090_v3  ;;  %60 = vst.msk [vmem:[#allocation2 + $0xc8] sm:$0xff] %vm33_vm0, %v1090_v3  ;;  %v108_v20 = vld [vmem:[%s1808_s1 + $0x98] sm:$0xff]  ;;  %v109_v21 = vld [vmem:[%s1808_s1 + $0xa0] sm:$0xff]  ;;  %v1325_v47 = vstv %s1240_s24  ;;  %v1328_v49 = vstv %s1254_s5 }
  0x19   :  { %62 = vst.msk [vmem:[#allocation2 + $0xd8] sm:$0xff] %vm33_vm0, %v1090_v3  ;;  %63 = vst.msk [vmem:[#allocation2 + $0xe0] sm:$0xff] %vm33_vm0, %v1090_v3  ;;  %v110_v22 = vld [vmem:[%s1808_s1 + $0xa8] sm:$0xff]  ;;  %v111_v23 = vld [vmem:[%s1808_s1 + $0xb0] sm:$0xff]  ;;  %v1332_v54 = vstv %s1268_s13 }
  0x1a   :  { %65 = vst.msk [vmem:[#allocation2 + $0xf0] sm:$0xff] %vm33_vm0, %v1090_v3  ;;  %66 = vst.msk [vmem:[#allocation2 + $0xf8] sm:$0xff] %vm33_vm0, %v1090_v3  ;;  %v112_v24 = vld [vmem:[%s1808_s1 + $0xb8] sm:$0xff]  ;;  %v113_v26 = vld [vmem:[%s1808_s1 + $0xc0] sm:$0xff] }
  0x1b   :  { %68 = vst.msk [vmem:[#allocation2 + $0x108] sm:$0xff] %vm33_vm0, %v1090_v3  ;;  %69 = vst.msk [vmem:[#allocation2 + $0x110] sm:$0xff] %vm33_vm0, %v1090_v3  ;;  %v114_v27 = vld [vmem:[%s1808_s1 + $0xc8] sm:$0xff]  ;;  %v115_v28 = vld [vmem:[%s1808_s1 + $0xd0] sm:$0xff] }
  0x1c   :  { %71 = vst.msk [vmem:[#allocation2 + $0x120] sm:$0xff] %vm33_vm0, %v1090_v3  ;;  %72 = vst.msk [vmem:[#allocation2 + $0x128] sm:$0xff] %vm33_vm0, %v1090_v3  ;;  %v116_v30 = vld [vmem:[%s1808_s1 + $0xd8] sm:$0xff]  ;;  %v117_v31 = vld [vmem:[%s1808_s1 + $0xe0] sm:$0xff]  ;;  %v1335_v56 = vstv %s1285_s25  ;;  %v1341_v62 = vstv %s1302_s4 }
  0x1d   :  { %74 = vst.msk [vmem:[#allocation2 + $0x138] sm:$0xff] %vm33_vm0, %v1090_v3  ;;  %75 = vst.msk [vmem:[#allocation2 + $0x140] sm:$0xff] %vm33_vm0, %v1090_v3  ;;  %v118_v32 = vld [vmem:[%s1808_s1 + $0xe8] sm:$0xff]  ;;  %v119_v34 = vld [vmem:[%s1808_s1 + $0xf0] sm:$0xff] }
  0x1e   :  { %77 = vst.msk [vmem:[#allocation2 + $0x150] sm:$0xff] %vm33_vm0, %v1090_v3  ;;  %78 = vst.msk [vmem:[#allocation2 + $0x158] sm:$0xff] %vm33_vm0, %v1090_v3  ;;  %v120_v35 = vld [vmem:[%s1808_s1 + $0xf8] sm:$0xff]  ;;  %v154_v36 = vld [vmem:[#allocation2] sm:$0xff] }
  0x1f   :  { %80 = vst.msk [vmem:[#allocation2 + $0x168] sm:$0xff] %vm33_vm0, %v1090_v3  ;;  %81 = vst.msk [vmem:[#allocation2 + $0x170] sm:$0xff] %vm33_vm0, %v1090_v3  ;;  %v187_v37 = vmul.f32 %v1271_v25, %v154_v36  ;;  %v251_v38 = vld [vmem:[#allocation2 + $0x1] sm:$0xff] }
  0x20   :  { %83 = vst.msk [vmem:[#allocation2 + $0x180] sm:$0xff] %vm33_vm0, %v1090_v3  ;;  %84 = vst.msk [vmem:[#allocation2 + $0x188] sm:$0xff] %vm33_vm0, %v1090_v3  ;;  %v348_v39 = vld [vmem:[#allocation2 + $0x2] sm:$0xff]  ;;  %v284_v40 = vmul.f32 %v1288_v29, %v251_v38 }
  0x21   :  { %86 = vst.msk [vmem:[#allocation2 + $0x198] sm:$0xff] %vm33_vm0, %v1090_v3  ;;  %87 = vst.msk [vmem:[#allocation2 + $0x1a0] sm:$0xff] %vm33_vm0, %v1090_v3  ;;  %v381_v41 = vmul.f32 %v1305_v33, %v348_v39  ;;  %v155_v45 = vld [vmem:[#allocation2 + $0x8] sm:$0xff] }
  0x22   :  { %37 = vst.msk [vmem:[#allocation2 + $0x10] sm:$0x3] %vm36_vm1, %v1090_v3  ;;  %40 = vst.msk [vmem:[#allocation2 + $0x28] sm:$0x3] %vm36_vm1, %v1090_v3  ;;  %v316_v46 = vadd.f32 %v284_v40, %v187_v37  ;;  %v188_v50 = vmul.f32 %v1271_v25, %v155_v45 }
  0x23   :  { %43 = vst.msk [vmem:[#allocation2 + $0x40] sm:$0x3] %vm36_vm1, %v1090_v3  ;;  %46 = vst.msk [vmem:[#allocation2 + $0x58] sm:$0x3] %vm36_vm1, %v1090_v3 }
  0x24   :  { %49 = vst.msk [vmem:[#allocation2 + $0x70] sm:$0x3] %vm36_vm1, %v1090_v3  ;;  %52 = vst.msk [vmem:[#allocation2 + $0x88] sm:$0x3] %vm36_vm1, %v1090_v3  ;;  %v413_v59 = vadd.f32 %v381_v41, %v316_v46 }
  0x25   :  { %55 = vst.msk [vmem:[#allocation2 + $0xa0] sm:$0x3] %vm36_vm1, %v1090_v3  ;;  %58 = vst.msk [vmem:[#allocation2 + $0xb8] sm:$0x3] %vm36_vm1, %v1090_v3 }
  0x26   :  { %61 = vst.msk [vmem:[#allocation2 + $0xd0] sm:$0x3] %vm36_vm1, %v1090_v3  ;;  %64 = vst.msk [vmem:[#allocation2 + $0xe8] sm:$0x3] %vm36_vm1, %v1090_v3 }
  0x27   :  { %67 = vst.msk [vmem:[#allocation2 + $0x100] sm:$0x3] %vm36_vm1, %v1090_v3  ;;  %70 = vst.msk [vmem:[#allocation2 + $0x118] sm:$0x3] %vm36_vm1, %v1090_v3 }
  0x28   :  { %73 = vst.msk [vmem:[#allocation2 + $0x130] sm:$0x3] %vm36_vm1, %v1090_v3  ;;  %76 = vst.msk [vmem:[#allocation2 + $0x148] sm:$0x3] %vm36_vm1, %v1090_v3 }
  0x29   :  { %79 = vst.msk [vmem:[#allocation2 + $0x160] sm:$0x3] %vm36_vm1, %v1090_v3  ;;  %82 = vst.msk [vmem:[#allocation2 + $0x178] sm:$0x3] %vm36_vm1, %v1090_v3  ;;  %v252_v51 = vld [vmem:[#allocation2 + $0x9] sm:$0xff] }
  0x2a   :  { %85 = vst.msk [vmem:[#allocation2 + $0x190] sm:$0x3] %vm36_vm1, %v1090_v3  ;;  %88 = vst.msk [vmem:[#allocation2 + $0x1a8] sm:$0x3] %vm36_vm1, %v1090_v3  ;;  %v349_v52 = vld [vmem:[#allocation2 + $0xa] sm:$0xff]  ;;  %v285_v57 = vmul.f32 %v1288_v29, %v252_v51 }
  0x2b   :  { %122 = vst.msk [vmem:[#allocation2 + $0x19] sm:$0xff] %vm33_vm0, %v89_v0  ;;  %123 = vst.msk [vmem:[#allocation2 + $0x21] sm:$0xff] %vm33_vm0, %v90_v1  ;;  %v382_v58 = vmul.f32 %v1305_v33, %v349_v52 }
  0x2c   :  { %124 = vst.msk [vmem:[#allocation2 + $0x31] sm:$0xff] %vm33_vm0, %v91_v2  ;;  %125 = vst.msk [vmem:[#allocation2 + $0x39] sm:$0xff] %vm33_vm0, %v92_v4  ;;  %v317_v4 = vadd.f32 %v285_v57, %v188_v50 }
  0x2d   :  { %126 = vst.msk [vmem:[#allocation2 + $0x49] sm:$0xff] %vm33_vm0, %v93_v5  ;;  %127 = vst.msk [vmem:[#allocation2 + $0x51] sm:$0xff] %vm33_vm0, %v94_v6 }
  0x2e   :  { %128 = vst.msk [vmem:[#allocation2 + $0x61] sm:$0xff] %vm33_vm0, %v95_v7  ;;  %129 = vst.msk [vmem:[#allocation2 + $0x69] sm:$0xff] %vm33_vm0, %v96_v8 }
  0x2f   :  { %130 = vst.msk [vmem:[#allocation2 + $0x79] sm:$0xff] %vm33_vm0, %v97_v9  ;;  %131 = vst.msk [vmem:[#allocation2 + $0x81] sm:$0xff] %vm33_vm0, %v98_v10 }
  0x30   :  { %132 = vst.msk [vmem:[#allocation2 + $0x91] sm:$0xff] %vm33_vm0, %v99_v11  ;;  %133 = vst.msk [vmem:[#allocation2 + $0x99] sm:$0xff] %vm33_vm0, %v100_v12  ;;  %v414_v12 = vadd.f32 %v382_v58, %v317_v4 }
  0x31   :  { %134 = vst.msk [vmem:[#allocation2 + $0xa9] sm:$0xff] %vm33_vm0, %v101_v13  ;;  %135 = vst.msk [vmem:[#allocation2 + $0xb1] sm:$0xff] %vm33_vm0, %v102_v14 }
  0x32   :  { %136 = vst.msk [vmem:[#allocation2 + $0xc1] sm:$0xff] %vm33_vm0, %v103_v15  ;;  %137 = vst.msk [vmem:[#allocation2 + $0xc9] sm:$0xff] %vm33_vm0, %v104_v16  ;;  %v445_v42 = vld [vmem:[#allocation2 + $0x18] sm:$0xff]  ;;  %v446_v63 = vld [vmem:[#allocation2 + $0x20] sm:$0xff] }
  0x33   :  { %138 = vst.msk [vmem:[#allocation2 + $0xd9] sm:$0xff] %vm33_vm0, %v105_v17  ;;  %139 = vst.msk [vmem:[#allocation2 + $0xe1] sm:$0xff] %vm33_vm0, %v106_v18  ;;  %v542_v44 = vld [vmem:[#allocation2 + $0x19] sm:$0xff]  ;;  %v737_v53 = vld [vmem:[#allocation2 + $0x30] sm:$0xff]  ;;  %v478_v60 = vmul.f32 %v1322_v43, %v445_v42  ;;  %v189_v1 = vmul.f32 %v445_v42, %v1271_v25  ;;  %v479_v13 = vmul.f32 %v1322_v43, %v446_v63 }
  0x34   :  { %140 = vst.msk [vmem:[#allocation2 + $0xf1] sm:$0xff] %vm33_vm0, %v107_v19  ;;  %141 = vst.msk [vmem:[#allocation2 + $0xf9] sm:$0xff] %vm33_vm0, %v108_v20  ;;  %v639_v48 = vld [vmem:[#allocation2 + $0x1a] sm:$0xff]  ;;  %v834_v55 = vld [vmem:[#allocation2 + $0x31] sm:$0xff]  ;;  %v575_v2 = vmul.f32 %v1325_v47, %v542_v44  ;;  %v770_v7 = vmul.f32 %v1332_v54, %v737_v53  ;;  %v286_v10 = vmul.f32 %v542_v44, %v1288_v29 }
  0x35   :  { %142 = vst.msk [vmem:[#allocation2 + $0x109] sm:$0xff] %vm33_vm0, %v109_v21  ;;  %143 = vst.msk [vmem:[#allocation2 + $0x111] sm:$0xff] %vm33_vm0, %v110_v22  ;;  %v931_v61 = vld [vmem:[#allocation2 + $0x32] sm:$0xff]  ;;  %v543_v0 = vld [vmem:[#allocation2 + $0x21] sm:$0xff]  ;;  %v672_v3 = vmul.f32 %v1328_v49, %v639_v48  ;;  %v510_v6 = vadd.f32 %v478_v60, %v413_v59  ;;  %v867_v8 = vmul.f32 %v1335_v56, %v834_v55 }
  0x36   :  { %144 = vst.msk [vmem:[#allocation2 + $0x121] sm:$0xff] %vm33_vm0, %v111_v23  ;;  %145 = vst.msk [vmem:[#allocation2 + $0x129] sm:$0xff] %vm33_vm0, %v112_v24  ;;  %v640_v5 = vld [vmem:[#allocation2 + $0x22] sm:$0xff]  ;;  %v738_v9 = vld [vmem:[#allocation2 + $0x38] sm:$0xff]  ;;  %v964_v11 = vmul.f32 %v1341_v62, %v931_v61  ;;  %v576_v14 = vmul.f32 %v1325_v47, %v543_v0  ;;  %v318_v19 = vadd.f32 %v286_v10, %v189_v1 }
  0x37   :  { %146 = vst.msk [vmem:[#allocation2 + $0x139] sm:$0xff] %vm33_vm0, %v113_v26  ;;  %147 = vst.msk [vmem:[#allocation2 + $0x141] sm:$0xff] %vm33_vm0, %v114_v27  ;;  %v835_v15 = vld [vmem:[#allocation2 + $0x39] sm:$0xff]  ;;  %v607_v16 = vadd.f32 %v575_v2, %v510_v6  ;;  %v673_v17 = vmul.f32 %v1328_v49, %v640_v5  ;;  %v383_v20 = vmul.f32 %v639_v48, %v1305_v33  ;;  %v836_v41 = vld [vmem:[#allocation2 + $0x49] sm:$0xff] }
  0x38   :  { %148 = vst.msk [vmem:[#allocation2 + $0x151] sm:$0xff] %vm33_vm0, %v115_v28  ;;  %149 = vst.msk [vmem:[#allocation2 + $0x159] sm:$0xff] %vm33_vm0, %v116_v30  ;;  %v1353_v18 = vld [vmem:[#allocation2 + $0x3a] sm:$0xff]  ;;  %v511_v21 = vadd.f32 %v479_v13, %v414_v12  ;;  %v771_v22 = vmul.f32 %v1332_v54, %v738_v9  ;;  %v190_v23 = vmul.f32 %v446_v63, %v1271_v25  ;;  %v933_v52 = vld [vmem:[#allocation2 + $0x4a] sm:$0xff] }
  0x39   :  { %150 = vst.msk [vmem:[#allocation2 + $0x169] sm:$0xff] %vm33_vm0, %v117_v31  ;;  %151 = vst.msk [vmem:[#allocation2 + $0x171] sm:$0xff] %vm33_vm0, %v118_v32  ;;  %v287_v24 = vmul.f32 %v543_v0, %v1288_v29  ;;  %v704_v26 = vadd.f32 %v672_v3, %v607_v16  ;;  %v868_v27 = vmul.f32 %v1335_v56, %v835_v15  ;;  %v740_v2 = vld [vmem:[#allocation2 + $0x50] sm:$0xff] }
  0x3a   :  { %152 = vst.msk [vmem:[#allocation2 + $0x181] sm:$0xff] %vm33_vm0, %v119_v34  ;;  %153 = vst.msk [vmem:[#allocation2 + $0x189] sm:$0xff] %vm33_vm0, %v120_v35  ;;  %v415_v28 = vadd.f32 %v383_v20, %v318_v19  ;;  %v480_v30 = vmul.f32 %v737_v53, %v1322_v43  ;;  %v608_v31 = vadd.f32 %v576_v14, %v511_v21  ;;  %v739_v34 = vld [vmem:[#allocation2 + $0x48] sm:$0xff]  ;;  %v934_v10 = vld [vmem:[#allocation2 + $0x52] sm:$0xff] }
  0x3b   :  { %v965_v32 = vmul.f32 %v1341_v62, %v1353_v18  ;;  %v319_v35 = vadd.f32 %v287_v24, %v190_v23  ;;  %v384_v36 = vmul.f32 %v640_v5, %v1305_v33  ;;  %v802_v37 = vadd.f32 %v770_v7, %v704_v26  ;;  %v741_v24 = vld [vmem:[#allocation2 + $0x60] sm:$0xff] }
  0x3c   :  { %v512_v38 = vadd.f32 %v480_v30, %v415_v28  ;;  %v577_v39 = vmul.f32 %v834_v55, %v1325_v47  ;;  %v674_v40 = vmul.f32 %v931_v61, %v1328_v49  ;;  %v705_v42 = vadd.f32 %v673_v17, %v608_v31  ;;  %v838_v26 = vld [vmem:[#allocation2 + $0x61] sm:$0xff] }
  0x3d   :  { %v416_v44 = vadd.f32 %v384_v36, %v319_v35  ;;  %v481_v45 = vmul.f32 %v738_v9, %v1322_v43  ;;  %v191_v46 = vmul.f32 %v737_v53, %v1271_v25  ;;  %v899_v48 = vadd.f32 %v867_v8, %v802_v37  ;;  %v935_v36 = vld [vmem:[#allocation2 + $0x62] sm:$0xff] }
  0x3e   :  { %v609_v50 = vadd.f32 %v577_v39, %v512_v38  ;;  %v772_v51 = vmul.f32 %v1332_v54, %v739_v34  ;;  %v288_v57 = vmul.f32 %v834_v55, %v1288_v29  ;;  %v803_v58 = vadd.f32 %v771_v22, %v705_v42  ;;  %v837_v55 = vld [vmem:[#allocation2 + $0x51] sm:$0xff] }
  0x3f   :  { %v869_v59 = vmul.f32 %v1335_v56, %v836_v41  ;;  %v513_v60 = vadd.f32 %v481_v45, %v416_v44  ;;  %v578_v63 = vmul.f32 %v835_v15, %v1325_v47  ;;  %v996_v0 = vadd.f32 %v964_v11, %v899_v48  ;;  %v742_v48 = vld [vmem:[#allocation2 + $0x68] sm:$0xff] }
  0x40   :  { %v706_v1 = vadd.f32 %v674_v40, %v609_v50  ;;  %v320_v3 = vadd.f32 %v288_v57, %v191_v46  ;;  %v385_v4 = vmul.f32 %v931_v61, %v1305_v33  ;;  %v900_v53 = vadd.f32 %v868_v27, %v803_v58  ;;  %v839_v50 = vld [vmem:[#allocation2 + $0x69] sm:$0xff] }
  0x41   :  { %v966_v5 = vmul.f32 %v1341_v62, %v933_v52  ;;  %v610_v6 = vadd.f32 %v578_v63, %v513_v60  ;;  %v675_v7 = vmul.f32 %v1353_v18, %v1328_v49  ;;  %1028 = vst.msk [vmem:[%s1809_s2] sm:$0xff] %vm33_vm0, %v996_v0  ;;  %v482_v12 = vmul.f32 %v739_v34, %v1322_v43  ;;  %v936_v63 = vld [vmem:[#allocation2 + $0x6a] sm:$0xff] }
  0x42   :  { %v804_v8 = vadd.f32 %v772_v51, %v706_v1  ;;  %v417_v11 = vadd.f32 %v385_v4, %v320_v3  ;;  %v192_v61 = vmul.f32 %v738_v9, %v1271_v25  ;;  %v997_v13 = vadd.f32 %v965_v32, %v900_v53 }
  0x43   :  { %v707_v14 = vadd.f32 %v675_v7, %v610_v6  ;;  %v773_v16 = vmul.f32 %v1332_v54, %v740_v2  ;;  %v289_v17 = vmul.f32 %v835_v15, %v1288_v29  ;;  %v870_v20 = vmul.f32 %v1335_v56, %v837_v55 }
  0x44   :  { %v901_v19 = vadd.f32 %v869_v59, %v804_v8  ;;  %v514_v21 = vadd.f32 %v482_v12, %v417_v11  ;;  %v579_v22 = vmul.f32 %v836_v41, %v1325_v47  ;;  %1029 = vst.msk [vmem:[%s1809_s2 + $0x8] sm:$0xff] %vm33_vm0, %v997_v13  ;;  %v967_v9 = vmul.f32 %v1341_v62, %v934_v10  ;;  %v743_v8 = vld [vmem:[#allocation2 + $0x78] sm:$0xff] }
  0x45   :  { %v805_v23 = vadd.f32 %v773_v16, %v707_v14  ;;  %v321_v27 = vadd.f32 %v289_v17, %v192_v61  ;;  %v386_v15 = vmul.f32 %v1353_v18, %v1305_v33  ;;  %v676_v31 = vmul.f32 %v933_v52, %v1328_v49  ;;  %v840_v11 = vld [vmem:[#allocation2 + $0x79] sm:$0xff] }
  0x46   :  { %v998_v28 = vadd.f32 %v966_v5, %v901_v19  ;;  %v611_v30 = vadd.f32 %v579_v22, %v514_v21  ;;  %v483_v32 = vmul.f32 %v740_v2, %v1322_v43  ;;  %v193_v38 = vmul.f32 %v739_v34, %v1271_v25  ;;  %v1417_v12 = vld [vmem:[#allocation2 + $0x7a] sm:$0xff] }
  0x47   :  { %v902_v35 = vadd.f32 %v870_v20, %v805_v23  ;;  %v418_v37 = vadd.f32 %v386_v15, %v321_v27  ;;  %v290_v39 = vmul.f32 %v836_v41, %v1288_v29  ;;  %v774_v18 = vmul.f32 %v1332_v54, %v741_v24  ;;  %v744_v21 = vld [vmem:[#allocation2 + $0x80] sm:$0xff] }
  0x48   :  { %1030 = vst.msk [vmem:[%s1809_s2 + $0x10] sm:$0xff] %vm33_vm0, %v998_v28  ;;  %v708_v40 = vadd.f32 %v676_v31, %v611_v30  ;;  %v871_v42 = vmul.f32 %v1335_v56, %v838_v26  ;;  %v580_v44 = vmul.f32 %v837_v55, %v1325_v47  ;;  %v387_v34 = vmul.f32 %v933_v52, %v1305_v33 }
  0x49   :  { %v999_v45 = vadd.f32 %v967_v9, %v902_v35  ;;  %v515_v46 = vadd.f32 %v483_v32, %v418_v37  ;;  %v322_v51 = vadd.f32 %v290_v39, %v193_v38  ;;  %v968_v57 = vmul.f32 %v1341_v62, %v935_v36  ;;  %v938_v37 = vld [vmem:[#allocation2 + $0x82] sm:$0xff] }
  0x4a   :  { %v806_v41 = vadd.f32 %v774_v18, %v708_v40  ;;  %v677_v58 = vmul.f32 %v934_v10, %v1328_v49  ;;  %v484_v59 = vmul.f32 %v741_v24, %v1322_v43  ;;  %v194_v1 = vmul.f32 %v740_v2, %v1271_v25 }
  0x4b   :  { %1031 = vst.msk [vmem:[%s1809_s2 + $0x18] sm:$0xff] %vm33_vm0, %v999_v45  ;;  %v612_v60 = vadd.f32 %v580_v44, %v515_v46  ;;  %v419_v0 = vadd.f32 %v387_v34, %v322_v51  ;;  %v291_v3 = vmul.f32 %v837_v55, %v1288_v29  ;;  %v775_v4 = vmul.f32 %v1332_v54, %v742_v48  ;;  %v745_v51 = vld [vmem:[#allocation2 + $0x90] sm:$0xff] }
  0x4c   :  { %v903_v52 = vadd.f32 %v871_v42, %v806_v41  ;;  %v872_v53 = vmul.f32 %v1335_v56, %v839_v50  ;;  %v581_v5 = vmul.f32 %v838_v26, %v1325_v47  ;;  %v388_v13 = vmul.f32 %v934_v10, %v1305_v33 }
  0x4d   :  { %v709_v6 = vadd.f32 %v677_v58, %v612_v60  ;;  %v516_v7 = vadd.f32 %v484_v59, %v419_v0  ;;  %v323_v61 = vadd.f32 %v291_v3, %v194_v1  ;;  %v969_v2 = vmul.f32 %v1341_v62, %v936_v63  ;;  %v842_v60 = vld [vmem:[#allocation2 + $0x91] sm:$0xff] }
  0x4e   :  { %v1000_v14 = vadd.f32 %v968_v57, %v903_v52  ;;  %v678_v55 = vmul.f32 %v935_v36, %v1328_v49  ;;  %v485_v16 = vmul.f32 %v742_v48, %v1322_v43  ;;  %v195_v22 = vmul.f32 %v741_v24, %v1271_v25  ;;  %v841_v24 = vld [vmem:[#allocation2 + $0x81] sm:$0xff]  ;;  %v1449_v0 = vld [vmem:[#allocation2 + $0x92] sm:$0xff] }
  0x4f   :  { %v807_v17 = vadd.f32 %v775_v4, %v709_v6  ;;  %v613_v19 = vadd.f32 %v581_v5, %v516_v7  ;;  %v420_v20 = vadd.f32 %v388_v13, %v323_v61  ;;  %v776_v10 = vmul.f32 %v1332_v54, %v743_v8 }
  0x50   :  { %1032 = vst.msk [vmem:[%s1809_s2 + $0x20] sm:$0xff] %vm33_vm0, %v1000_v14  ;;  %v873_v23 = vmul.f32 %v1335_v56, %v840_v11  ;;  %v970_v9 = vmul.f32 %v1341_v62, %v1417_v12  ;;  %v292_v27 = vmul.f32 %v838_v26, %v1288_v29  ;;  %v582_v31 = vmul.f32 %v839_v50, %v1325_v47 }
  0x51   :  { %v904_v15 = vadd.f32 %v872_v53, %v807_v17  ;;  %v710_v28 = vadd.f32 %v678_v55, %v613_v19  ;;  %v517_v30 = vadd.f32 %v485_v16, %v420_v20  ;;  %v679_v32 = vmul.f32 %v936_v63, %v1328_v49  ;;  %v746_v16 = vld [vmem:[#allocation2 + $0x98] sm:$0xff] }
  0x52   :  { %v777_v35 = vmul.f32 %v1332_v54, %v744_v21  ;;  %v324_v38 = vadd.f32 %v292_v27, %v195_v22  ;;  %v389_v39 = vmul.f32 %v935_v36, %v1305_v33  ;;  %v196_v44 = vmul.f32 %v742_v48, %v1271_v25  ;;  %v843_v17 = vld [vmem:[#allocation2 + $0x99] sm:$0xff] }
  0x53   :  { %v1001_v40 = vadd.f32 %v969_v2, %v904_v15  ;;  %v808_v18 = vadd.f32 %v776_v10, %v710_v28  ;;  %v614_v42 = vadd.f32 %v582_v31, %v517_v30  ;;  %v874_v26 = vmul.f32 %v1335_v56, %v841_v24  ;;  %v940_v15 = vld [vmem:[#allocation2 + $0x9a] sm:$0xff] }
  0x54   :  { %v421_v45 = vadd.f32 %v389_v39, %v324_v38  ;;  %v486_v46 = vmul.f32 %v743_v8, %v1322_v43  ;;  %v293_v34 = vmul.f32 %v839_v50, %v1288_v29  ;;  %v971_v57 = vmul.f32 %v1341_v62, %v938_v37 }
  0x55   :  { %1033 = vst.msk [vmem:[%s1809_s2 + $0x28] sm:$0xff] %vm33_vm0, %v1001_v40  ;;  %v905_v41 = vadd.f32 %v873_v23, %v808_v18  ;;  %v711_v36 = vadd.f32 %v679_v32, %v614_v42  ;;  %v583_v58 = vmul.f32 %v840_v11, %v1325_v47  ;;  %v680_v59 = vmul.f32 %v1417_v12, %v1328_v49  ;;  %v747_v40 = vld [vmem:[#allocation2 + $0xa8] sm:$0xff] }
  0x56   :  { %v518_v48 = vadd.f32 %v486_v46, %v421_v45  ;;  %v325_v1 = vadd.f32 %v293_v34, %v196_v44  ;;  %v390_v50 = vmul.f32 %v936_v63, %v1305_v33  ;;  %v778_v4 = vmul.f32 %v1332_v54, %v745_v51  ;;  %v844_v18 = vld [vmem:[#allocation2 + $0xa9] sm:$0xff] }
  0x57   :  { %v1002_v3 = vadd.f32 %v970_v9, %v905_v41  ;;  %v809_v52 = vadd.f32 %v777_v35, %v711_v36  ;;  %v197_v53 = vmul.f32 %v743_v8, %v1271_v25  ;;  %v487_v7 = vmul.f32 %v744_v21, %v1322_v43  ;;  %v1478_v42 = vld [vmem:[#allocation2 + $0xaa] sm:$0xff] }
  0x58   :  { %v615_v5 = vadd.f32 %v583_v58, %v518_v48  ;;  %v422_v6 = vadd.f32 %v390_v50, %v325_v1  ;;  %v294_v61 = vmul.f32 %v840_v11, %v1288_v29  ;;  %v875_v63 = vmul.f32 %v1335_v56, %v842_v60 }
  0x59   :  { %1034 = vst.msk [vmem:[%s1809_s2 + $0x30] sm:$0xff] %vm33_vm0, %v1002_v3  ;;  %v906_v13 = vadd.f32 %v874_v26, %v809_v52  ;;  %v972_v14 = vmul.f32 %v1341_v62, %v1449_v0  ;;  %v584_v2 = vmul.f32 %v841_v24, %v1325_v47  ;;  %v391_v11 = vmul.f32 %v1417_v12, %v1305_v33 }
  0x5a   :  { %v712_v8 = vadd.f32 %v680_v59, %v615_v5  ;;  %v519_v55 = vadd.f32 %v487_v7, %v422_v6  ;;  %v326_v19 = vadd.f32 %v294_v61, %v197_v53  ;;  %v681_v22 = vmul.f32 %v938_v37, %v1328_v49  ;;  %v942_v6 = vld [vmem:[#allocation2 + $0xb2] sm:$0xff] }
  0x5b   :  { %v1003_v20 = vadd.f32 %v971_v57, %v906_v13  ;;  %v488_v10 = vmul.f32 %v745_v51, %v1322_v43  ;;  %v198_v23 = vmul.f32 %v744_v21, %v1271_v25  ;;  %v295_v30 = vmul.f32 %v841_v24, %v1288_v29  ;;  %v748_v57 = vld [vmem:[#allocation2 + $0xb0] sm:$0xff] }
  0x5c   :  { %v810_v9 = vadd.f32 %v778_v4, %v712_v8  ;;  %v616_v27 = vadd.f32 %v584_v2, %v519_v55  ;;  %v423_v28 = vadd.f32 %v391_v11, %v326_v19  ;;  %v779_v12 = vmul.f32 %v1332_v54, %v746_v16  ;;  %v845_v4 = vld [vmem:[#allocation2 + $0xb1] sm:$0xff]  ;;  %v749_v19 = vld [vmem:[#allocation2 + $0xc0] sm:$0xff] }
  0x5d   :  { %1035 = vst.msk [vmem:[%s1809_s2 + $0x38] sm:$0xff] %vm33_vm0, %v1003_v20  ;;  %v876_v31 = vmul.f32 %v1335_v56, %v843_v17  ;;  %v585_v32 = vmul.f32 %v842_v60, %v1325_v47  ;;  %v392_v35 = vmul.f32 %v938_v37, %v1305_v33  ;;  %v327_v24 = vadd.f32 %v295_v30, %v198_v23 }
  0x5e   :  { %v907_v21 = vadd.f32 %v875_v63, %v810_v9  ;;  %v713_v38 = vadd.f32 %v681_v22, %v616_v27  ;;  %v520_v39 = vadd.f32 %v488_v10, %v423_v28  ;;  %v973_v44 = vmul.f32 %v1341_v62, %v940_v15  ;;  %v846_v9 = vld [vmem:[#allocation2 + $0xc1] sm:$0xff] }
  0x5f   :  { %v682_v26 = vmul.f32 %v1449_v0, %v1328_v49  ;;  %v489_v45 = vmul.f32 %v746_v16, %v1322_v43  ;;  %v199_v46 = vmul.f32 %v745_v51, %v1271_v25  ;;  %v424_v36 = vadd.f32 %v392_v35, %v327_v24  ;;  %v1511_v27 = vld [vmem:[#allocation2 + $0xc2] sm:$0xff] }
  0x60   :  { %v1004_v34 = vadd.f32 %v972_v14, %v907_v21  ;;  %v811_v41 = vadd.f32 %v779_v12, %v713_v38  ;;  %v617_v37 = vadd.f32 %v585_v32, %v520_v39  ;;  %v780_v58 = vmul.f32 %v1332_v54, %v747_v40 }
  0x61   :  { %v877_v48 = vmul.f32 %v1335_v56, %v844_v18  ;;  %v974_v59 = vmul.f32 %v1341_v62, %v1478_v42  ;;  %v296_v1 = vmul.f32 %v842_v60, %v1288_v29  ;;  %v521_v3 = vadd.f32 %v489_v45, %v424_v36 }
  0x62   :  { %1036 = vst.msk [vmem:[%s1809_s2 + $0x40] sm:$0xff] %vm33_vm0, %v1004_v34  ;;  %v908_v51 = vadd.f32 %v876_v31, %v811_v41  ;;  %v714_v50 = vadd.f32 %v682_v26, %v617_v37  ;;  %v586_v52 = vmul.f32 %v843_v17, %v1325_v47  ;;  %v683_v53 = vmul.f32 %v940_v15, %v1328_v49  ;;  %v847_v34 = vld [vmem:[#allocation2 + $0xc9] sm:$0xff] }
  0x63   :  { %v781_v5 = vmul.f32 %v1332_v54, %v748_v57  ;;  %v328_v7 = vadd.f32 %v296_v1, %v199_v46  ;;  %v393_v60 = vmul.f32 %v1449_v0, %v1305_v33  ;;  %v200_v14 = vmul.f32 %v746_v16, %v1271_v25  ;;  %v750_v46 = vld [vmem:[#allocation2 + $0xc8] sm:$0xff] }
  0x64   :  { %v1005_v61 = vadd.f32 %v973_v44, %v908_v51  ;;  %v812_v13 = vadd.f32 %v780_v58, %v714_v50  ;;  %v618_v63 = vadd.f32 %v586_v52, %v521_v3  ;;  %v878_v2 = vmul.f32 %v1335_v56, %v845_v4  ;;  %v944_v51 = vld [vmem:[#allocation2 + $0xca] sm:$0xff] }
  0x65   :  { %v425_v8 = vadd.f32 %v393_v60, %v328_v7  ;;  %v490_v55 = vmul.f32 %v747_v40, %v1322_v43  ;;  %v297_v11 = vmul.f32 %v843_v17, %v1288_v29  ;;  %v975_v22 = vmul.f32 %v1341_v62, %v942_v6 }
  0x66   :  { %1037 = vst.msk [vmem:[%s1809_s2 + $0x48] sm:$0xff] %vm33_vm0, %v1005_v61  ;;  %v909_v20 = vadd.f32 %v877_v48, %v812_v13  ;;  %v715_v0 = vadd.f32 %v683_v53, %v618_v63  ;;  %v587_v10 = vmul.f32 %v844_v18, %v1325_v47  ;;  %v684_v23 = vmul.f32 %v1478_v42, %v1328_v49  ;;  %v751_v61 = vld [vmem:[#allocation2 + $0xd8] sm:$0xff] }
  0x67   :  { %v522_v16 = vadd.f32 %v490_v55, %v425_v8  ;;  %v329_v28 = vadd.f32 %v297_v11, %v200_v14  ;;  %v394_v17 = vmul.f32 %v940_v15, %v1305_v33  ;;  %v782_v31 = vmul.f32 %v1332_v54, %v749_v19  ;;  %v848_v13 = vld [vmem:[#allocation2 + $0xd9] sm:$0xff] }
  0x68   :  { %v1006_v30 = vadd.f32 %v974_v59, %v909_v20  ;;  %v813_v12 = vadd.f32 %v781_v5, %v715_v0  ;;  %v201_v32 = vmul.f32 %v747_v40, %v1271_v25  ;;  %v491_v38 = vmul.f32 %v748_v57, %v1322_v43  ;;  %v1540_v63 = vld [vmem:[#allocation2 + $0xda] sm:$0xff] }
  0x69   :  { %v619_v35 = vadd.f32 %v587_v10, %v522_v16  ;;  %v426_v21 = vadd.f32 %v394_v17, %v329_v28  ;;  %v298_v39 = vmul.f32 %v844_v18, %v1288_v29  ;;  %v879_v15 = vmul.f32 %v1335_v56, %v846_v9 }
  0x6a   :  { %1038 = vst.msk [vmem:[%s1809_s2 + $0x50] sm:$0xff] %vm33_vm0, %v1006_v30  ;;  %v910_v24 = vadd.f32 %v878_v2, %v813_v12  ;;  %v976_v44 = vmul.f32 %v1341_v62, %v1511_v27  ;;  %v588_v26 = vmul.f32 %v845_v4, %v1325_v47  ;;  %v395_v18 = vmul.f32 %v1478_v42, %v1305_v33 }
  0x6b   :  { %v716_v40 = vadd.f32 %v684_v23, %v619_v35  ;;  %v523_v45 = vadd.f32 %v491_v38, %v426_v21  ;;  %v330_v41 = vadd.f32 %v298_v39, %v201_v32  ;;  %v685_v36 = vmul.f32 %v942_v6, %v1328_v49  ;;  %v946_v21 = vld [vmem:[#allocation2 + $0xe2] sm:$0xff] }
  0x6c   :  { %v1007_v37 = vadd.f32 %v975_v22, %v910_v24  ;;  %v492_v58 = vmul.f32 %v749_v19, %v1322_v43  ;;  %v202_v48 = vmul.f32 %v748_v57, %v1271_v25  ;;  %v299_v3 = vmul.f32 %v845_v4, %v1288_v29  ;;  %v752_v22 = vld [vmem:[#allocation2 + $0xe0] sm:$0xff] }
  0x6d   :  { %v814_v59 = vadd.f32 %v782_v31, %v716_v40  ;;  %v620_v1 = vadd.f32 %v588_v26, %v523_v45  ;;  %v427_v50 = vadd.f32 %v395_v18, %v330_v41  ;;  %v783_v42 = vmul.f32 %v1332_v54, %v750_v46  ;;  %v849_v31 = vld [vmem:[#allocation2 + $0xe1] sm:$0xff]  ;;  %v753_v41 = vld [vmem:[#allocation2 + $0xf0] sm:$0xff] }
  0x6e   :  { %1039 = vst.msk [vmem:[%s1809_s2 + $0x58] sm:$0xff] %vm33_vm0, %v1007_v37  ;;  %v880_v52 = vmul.f32 %v1335_v56, %v847_v34  ;;  %v589_v53 = vmul.f32 %v846_v9, %v1325_v47  ;;  %v396_v5 = vmul.f32 %v942_v6, %v1305_v33  ;;  %v331_v4 = vadd.f32 %v299_v3, %v202_v48 }
  0x6f   :  { %v911_v57 = vadd.f32 %v879_v15, %v814_v59  ;;  %v717_v7 = vadd.f32 %v685_v36, %v620_v1  ;;  %v524_v60 = vadd.f32 %v492_v58, %v427_v50  ;;  %v977_v14 = vmul.f32 %v1341_v62, %v944_v51  ;;  %v850_v59 = vld [vmem:[#allocation2 + $0xf1] sm:$0xff] }
  0x70   :  { %v686_v2 = vmul.f32 %v1511_v27, %v1328_v49  ;;  %v493_v8 = vmul.f32 %v750_v46, %v1322_v43  ;;  %v203_v55 = vmul.f32 %v749_v19, %v1271_v25  ;;  %v428_v0 = vadd.f32 %v396_v5, %v331_v4  ;;  %v1573_v1 = vld [vmem:[#allocation2 + $0xf2] sm:$0xff] }
  0x71   :  { %v1008_v11 = vadd.f32 %v976_v44, %v911_v57  ;;  %v815_v20 = vadd.f32 %v783_v42, %v717_v7  ;;  %v621_v6 = vadd.f32 %v589_v53, %v524_v60  ;;  %v784_v10 = vmul.f32 %v1332_v54, %v751_v61 }
  0x72   :  { %v881_v16 = vmul.f32 %v1335_v56, %v848_v13  ;;  %v978_v23 = vmul.f32 %v1341_v62, %v1540_v63  ;;  %v300_v28 = vmul.f32 %v846_v9, %v1288_v29  ;;  %v525_v30 = vadd.f32 %v493_v8, %v428_v0 }
  0x73   :  { %1040 = vst.msk [vmem:[%s1809_s2 + $0x60] sm:$0xff] %vm33_vm0, %v1008_v11  ;;  %v912_v19 = vadd.f32 %v880_v52, %v815_v20  ;;  %v718_v17 = vadd.f32 %v686_v2, %v621_v6  ;;  %v590_v12 = vmul.f32 %v847_v34, %v1325_v47  ;;  %v687_v32 = vmul.f32 %v944_v51, %v1328_v49  ;;  %v851_v11 = vld [vmem:[#allocation2 + $0xf9] sm:$0xff] }
  0x74   :  { %v785_v35 = vmul.f32 %v1332_v54, %v752_v22  ;;  %v332_v38 = vadd.f32 %v300_v28, %v203_v55  ;;  %v397_v9 = vmul.f32 %v1511_v27, %v1305_v33  ;;  %v204_v44 = vmul.f32 %v750_v46, %v1271_v25  ;;  %v754_v55 = vld [vmem:[#allocation2 + $0xf8] sm:$0xff] }
  0x75   :  { %v1009_v39 = vadd.f32 %v977_v14, %v912_v19  ;;  %v816_v24 = vadd.f32 %v784_v10, %v718_v17  ;;  %v622_v15 = vadd.f32 %v590_v12, %v525_v30  ;;  %v882_v26 = vmul.f32 %v1335_v56, %v849_v31  ;;  %v948_v19 = vld [vmem:[#allocation2 + $0xfa] sm:$0xff] }
  0x76   :  { %v429_v40 = vadd.f32 %v397_v9, %v332_v38  ;;  %v494_v45 = vmul.f32 %v751_v61, %v1322_v43  ;;  %v301_v18 = vmul.f32 %v847_v34, %v1288_v29  ;;  %v979_v36 = vmul.f32 %v1341_v62, %v946_v21 }
  0x77   :  { %1041 = vst.msk [vmem:[%s1809_s2 + $0x68] sm:$0xff] %vm33_vm0, %v1009_v39  ;;  %v913_v37 = vadd.f32 %v881_v16, %v816_v24  ;;  %v719_v27 = vadd.f32 %v687_v32, %v622_v15  ;;  %v591_v58 = vmul.f32 %v848_v13, %v1325_v47  ;;  %v688_v48 = vmul.f32 %v1540_v63, %v1328_v49  ;;  %v755_v39 = vld [vmem:[#allocation2 + $0x108] sm:$0xff] }
  0x78   :  { %v526_v46 = vadd.f32 %v494_v45, %v429_v40  ;;  %v333_v50 = vadd.f32 %v301_v18, %v204_v44  ;;  %v398_v34 = vmul.f32 %v944_v51, %v1305_v33  ;;  %v786_v52 = vmul.f32 %v1332_v54, %v753_v41  ;;  %v852_v24 = vld [vmem:[#allocation2 + $0x109] sm:$0xff] }
  0x79   :  { %v1010_v3 = vadd.f32 %v978_v23, %v913_v37  ;;  %v817_v42 = vadd.f32 %v785_v35, %v719_v27  ;;  %v205_v53 = vmul.f32 %v751_v61, %v1271_v25  ;;  %v495_v7 = vmul.f32 %v752_v22, %v1322_v43  ;;  %v1602_v15 = vld [vmem:[#allocation2 + $0x10a] sm:$0xff] }
  0x7a   :  { %v623_v5 = vadd.f32 %v591_v58, %v526_v46  ;;  %v430_v57 = vadd.f32 %v398_v34, %v333_v50  ;;  %v302_v60 = vmul.f32 %v848_v13, %v1288_v29  ;;  %v883_v51 = vmul.f32 %v1335_v56, %v850_v59 }
  0x7b   :  { %1042 = vst.msk [vmem:[%s1809_s2 + $0x70] sm:$0xff] %vm33_vm0, %v1010_v3  ;;  %v914_v4 = vadd.f32 %v882_v26, %v817_v42  ;;  %v980_v14 = vmul.f32 %v1341_v62, %v1573_v1  ;;  %v592_v2 = vmul.f32 %v849_v31, %v1325_v47  ;;  %v399_v13 = vmul.f32 %v1540_v63, %v1305_v33 }
  0x7c   :  { %v720_v61 = vadd.f32 %v688_v48, %v623_v5  ;;  %v527_v8 = vadd.f32 %v495_v7, %v430_v57  ;;  %v334_v20 = vadd.f32 %v302_v60, %v205_v53  ;;  %v689_v0 = vmul.f32 %v946_v21, %v1328_v49  ;;  %v950_v57 = vld [vmem:[#allocation2 + $0x112] sm:$0xff] }
  0x7d   :  { %v1011_v6 = vadd.f32 %v979_v36, %v914_v4  ;;  %v496_v10 = vmul.f32 %v753_v41, %v1322_v43  ;;  %v206_v16 = vmul.f32 %v752_v22, %v1271_v25  ;;  %v303_v30 = vmul.f32 %v849_v31, %v1288_v29  ;;  %v756_v36 = vld [vmem:[#allocation2 + $0x110] sm:$0xff] }
  0x7e   :  { %v818_v23 = vadd.f32 %v786_v52, %v720_v61  ;;  %v624_v28 = vadd.f32 %v592_v2, %v527_v8  ;;  %v431_v17 = vadd.f32 %v399_v13, %v334_v20  ;;  %v787_v63 = vmul.f32 %v1332_v54, %v754_v55  ;;  %v853_v52 = vld [vmem:[#allocation2 + $0x111] sm:$0xff]  ;;  %v757_v20 = vld [vmem:[#allocation2 + $0x120] sm:$0xff] }
  0x7f   :  { %1043 = vst.msk [vmem:[%s1809_s2 + $0x78] sm:$0xff] %vm33_vm0, %v1011_v6  ;;  %v884_v12 = vmul.f32 %v1335_v56, %v851_v11  ;;  %v593_v32 = vmul.f32 %v850_v59, %v1325_v47  ;;  %v400_v35 = vmul.f32 %v946_v21, %v1305_v33  ;;  %v335_v31 = vadd.f32 %v303_v30, %v206_v16 }
  0x80   :  { %v915_v22 = vadd.f32 %v883_v51, %v818_v23  ;;  %v721_v38 = vadd.f32 %v689_v0, %v624_v28  ;;  %v528_v9 = vadd.f32 %v496_v10, %v431_v17  ;;  %v981_v44 = vmul.f32 %v1341_v62, %v948_v19  ;;  %v854_v23 = vld [vmem:[#allocation2 + $0x121] sm:$0xff] }
  0x81   :  { %v690_v26 = vmul.f32 %v1573_v1, %v1328_v49  ;;  %v497_v40 = vmul.f32 %v754_v55, %v1322_v43  ;;  %v207_v45 = vmul.f32 %v753_v41, %v1271_v25  ;;  %v432_v27 = vadd.f32 %v400_v35, %v335_v31  ;;  %v1635_v28 = vld [vmem:[#allocation2 + $0x122] sm:$0xff] }
  0x82   :  { %v1012_v18 = vadd.f32 %v980_v14, %v915_v22  ;;  %v819_v37 = vadd.f32 %v787_v63, %v721_v38  ;;  %v625_v21 = vadd.f32 %v593_v32, %v528_v9  ;;  %v788_v58 = vmul.f32 %v1332_v54, %v755_v39 }
  0x83   :  { %v885_v46 = vmul.f32 %v1335_v56, %v852_v24  ;;  %v982_v48 = vmul.f32 %v1341_v62, %v1602_v15  ;;  %v304_v50 = vmul.f32 %v850_v59, %v1288_v29  ;;  %v529_v3 = vadd.f32 %v497_v40, %v432_v27 }
  0x84   :  { %1044 = vst.msk [vmem:[%s1809_s2 + $0x80] sm:$0xff] %vm33_vm0, %v1012_v18  ;;  %v916_v41 = vadd.f32 %v884_v12, %v819_v37  ;;  %v722_v34 = vadd.f32 %v690_v26, %v625_v21  ;;  %v594_v42 = vmul.f32 %v851_v11, %v1325_v47  ;;  %v691_v53 = vmul.f32 %v948_v19, %v1328_v49  ;;  %v855_v18 = vld [vmem:[#allocation2 + $0x129] sm:$0xff] }
  0x85   :  { %v789_v5 = vmul.f32 %v1332_v54, %v756_v36  ;;  %v336_v7 = vadd.f32 %v304_v50, %v207_v45  ;;  %v401_v59 = vmul.f32 %v1573_v1, %v1305_v33  ;;  %v208_v14 = vmul.f32 %v754_v55, %v1271_v25  ;;  %v758_v45 = vld [vmem:[#allocation2 + $0x128] sm:$0xff] }
  0x86   :  { %v1013_v60 = vadd.f32 %v981_v44, %v916_v41  ;;  %v820_v4 = vadd.f32 %v788_v58, %v722_v34  ;;  %v626_v51 = vadd.f32 %v594_v42, %v529_v3  ;;  %v886_v2 = vmul.f32 %v1335_v56, %v853_v52  ;;  %v952_v41 = vld [vmem:[#allocation2 + $0x12a] sm:$0xff] }
  0x87   :  { %v433_v61 = vadd.f32 %v401_v59, %v336_v7  ;;  %v498_v8 = vmul.f32 %v755_v39, %v1322_v43  ;;  %v305_v13 = vmul.f32 %v851_v11, %v1288_v29  ;;  %v983_v0 = vmul.f32 %v1341_v62, %v950_v57 }
  0x88   :  { %1045 = vst.msk [vmem:[%s1809_s2 + $0x88] sm:$0xff] %vm33_vm0, %v1013_v60  ;;  %v917_v6 = vadd.f32 %v885_v46, %v820_v4  ;;  %v723_v1 = vadd.f32 %v691_v53, %v626_v51  ;;  %v595_v10 = vmul.f32 %v852_v24, %v1325_v47  ;;  %v692_v16 = vmul.f32 %v1602_v15, %v1328_v49  ;;  %v759_v60 = vld [vmem:[#allocation2 + $0x138] sm:$0xff] }
  0x89   :  { %v530_v55 = vadd.f32 %v498_v8, %v433_v61  ;;  %v337_v17 = vadd.f32 %v305_v13, %v208_v14  ;;  %v402_v11 = vmul.f32 %v948_v19, %v1305_v33  ;;  %v790_v12 = vmul.f32 %v1332_v54, %v757_v20  ;;  %v856_v4 = vld [vmem:[#allocation2 + $0x139] sm:$0xff] }
  0x8a   :  { %v1014_v30 = vadd.f32 %v982_v48, %v917_v6  ;;  %v821_v63 = vadd.f32 %v789_v5, %v723_v1  ;;  %v209_v32 = vmul.f32 %v755_v39, %v1271_v25  ;;  %v499_v38 = vmul.f32 %v756_v36, %v1322_v43  ;;  %v1664_v51 = vld [vmem:[#allocation2 + $0x13a] sm:$0xff] }
  0x8b   :  { %v627_v35 = vadd.f32 %v595_v10, %v530_v55  ;;  %v434_v22 = vadd.f32 %v402_v11, %v337_v17  ;;  %v306_v9 = vmul.f32 %v852_v24, %v1288_v29  ;;  %v887_v19 = vmul.f32 %v1335_v56, %v854_v23 }
  0x8c   :  { %1046 = vst.msk [vmem:[%s1809_s2 + $0x90] sm:$0xff] %vm33_vm0, %v1014_v30  ;;  %v918_v31 = vadd.f32 %v886_v2, %v821_v63  ;;  %v984_v44 = vmul.f32 %v1341_v62, %v1635_v28  ;;  %v596_v26 = vmul.f32 %v853_v52, %v1325_v47  ;;  %v403_v24 = vmul.f32 %v1602_v15, %v1305_v33 }
  0x8d   :  { %v724_v39 = vadd.f32 %v692_v16, %v627_v35  ;;  %v531_v40 = vadd.f32 %v499_v38, %v434_v22  ;;  %v338_v37 = vadd.f32 %v306_v9, %v209_v32  ;;  %v693_v27 = vmul.f32 %v950_v57, %v1328_v49  ;;  %v954_v22 = vld [vmem:[#allocation2 + $0x142] sm:$0xff] }
  0x8e   :  { %v1015_v21 = vadd.f32 %v983_v0, %v918_v31  ;;  %v500_v58 = vmul.f32 %v757_v20, %v1322_v43  ;;  %v210_v46 = vmul.f32 %v756_v36, %v1271_v25  ;;  %v307_v3 = vmul.f32 %v853_v52, %v1288_v29  ;;  %v760_v0 = vld [vmem:[#allocation2 + $0x140] sm:$0xff] }
  0x8f   :  { %v822_v48 = vadd.f32 %v790_v12, %v724_v39  ;;  %v628_v50 = vadd.f32 %v596_v26, %v531_v40  ;;  %v435_v34 = vadd.f32 %v403_v24, %v338_v37  ;;  %v791_v15 = vmul.f32 %v1332_v54, %v758_v45  ;;  %v857_v12 = vld [vmem:[#allocation2 + $0x141] sm:$0xff]  ;;  %v761_v37 = vld [vmem:[#allocation2 + $0x150] sm:$0xff] }
  0x90   :  { %1047 = vst.msk [vmem:[%s1809_s2 + $0x98] sm:$0xff] %vm33_vm0, %v1015_v21  ;;  %v888_v42 = vmul.f32 %v1335_v56, %v855_v18  ;;  %v597_v53 = vmul.f32 %v854_v23, %v1325_v47  ;;  %v404_v5 = vmul.f32 %v950_v57, %v1305_v33  ;;  %v339_v52 = vadd.f32 %v307_v3, %v210_v46 }
  0x91   :  { %v919_v36 = vadd.f32 %v887_v19, %v822_v48  ;;  %v725_v7 = vadd.f32 %v693_v27, %v628_v50  ;;  %v532_v59 = vadd.f32 %v500_v58, %v435_v34  ;;  %v985_v14 = vmul.f32 %v1341_v62, %v952_v41  ;;  %v858_v48 = vld [vmem:[#allocation2 + $0x151] sm:$0xff] }
  0x92   :  { %v694_v2 = vmul.f32 %v1635_v28, %v1328_v49  ;;  %v501_v61 = vmul.f32 %v758_v45, %v1322_v43  ;;  %v211_v8 = vmul.f32 %v757_v20, %v1271_v25  ;;  %v436_v1 = vadd.f32 %v404_v5, %v339_v52  ;;  %v1697_v50 = vld [vmem:[#allocation2 + $0x152] sm:$0xff] }
  0x93   :  { %v1016_v13 = vadd.f32 %v984_v44, %v919_v36  ;;  %v823_v6 = vadd.f32 %v791_v15, %v725_v7  ;;  %v629_v57 = vadd.f32 %v597_v53, %v532_v59  ;;  %v792_v10 = vmul.f32 %v1332_v54, %v759_v60 }
  0x94   :  { %v889_v55 = vmul.f32 %v1335_v56, %v856_v4  ;;  %v986_v16 = vmul.f32 %v1341_v62, %v1664_v51  ;;  %v308_v17 = vmul.f32 %v854_v23, %v1288_v29  ;;  %v533_v30 = vadd.f32 %v501_v61, %v436_v1 }
  0x95   :  { %1048 = vst.msk [vmem:[%s1809_s2 + $0xa0] sm:$0xff] %vm33_vm0, %v1016_v13  ;;  %v920_v20 = vadd.f32 %v888_v42, %v823_v6  ;;  %v726_v11 = vadd.f32 %v694_v2, %v629_v57  ;;  %v598_v63 = vmul.f32 %v855_v18, %v1325_v47  ;;  %v695_v32 = vmul.f32 %v952_v41, %v1328_v49  ;;  %v859_v13 = vld [vmem:[#allocation2 + $0x159] sm:$0xff] }
  0x96   :  { %v793_v35 = vmul.f32 %v1332_v54, %v760_v0  ;;  %v340_v38 = vadd.f32 %v308_v17, %v211_v8  ;;  %v405_v23 = vmul.f32 %v1635_v28, %v1305_v33  ;;  %v212_v44 = vmul.f32 %v758_v45, %v1271_v25  ;;  %v762_v8 = vld [vmem:[#allocation2 + $0x158] sm:$0xff] }
  0x97   :  { %v1017_v9 = vadd.f32 %v985_v14, %v920_v20  ;;  %v824_v31 = vadd.f32 %v792_v10, %v726_v11  ;;  %v630_v19 = vadd.f32 %v598_v63, %v533_v30  ;;  %v890_v26 = vmul.f32 %v1335_v56, %v857_v12  ;;  %v956_v20 = vld [vmem:[#allocation2 + $0x15a] sm:$0xff] }
  0x98   :  { %v437_v39 = vadd.f32 %v405_v23, %v340_v38  ;;  %v502_v40 = vmul.f32 %v759_v60, %v1322_v43  ;;  %v309_v24 = vmul.f32 %v855_v18, %v1288_v29  ;;  %v987_v27 = vmul.f32 %v1341_v62, %v954_v22 }
  0x99   :  { %1049 = vst.msk [vmem:[%s1809_s2 + $0xa8] sm:$0xff] %vm33_vm0, %v1017_v9  ;;  %v921_v21 = vadd.f32 %v889_v55, %v824_v31  ;;  %v727_v28 = vadd.f32 %v695_v32, %v630_v19  ;;  %v599_v58 = vmul.f32 %v856_v4, %v1325_v47  ;;  %v696_v46 = vmul.f32 %v1664_v51, %v1328_v49  ;;  %v763_v9 = vld [vmem:[#allocation2 + $0x168] sm:$0xff] }
  0x9a   :  { %v534_v45 = vadd.f32 %v502_v40, %v437_v39  ;;  %v341_v34 = vadd.f32 %v309_v24, %v212_v44  ;;  %v406_v18 = vmul.f32 %v952_v41, %v1305_v33  ;;  %v794_v42 = vmul.f32 %v1332_v54, %v761_v37  ;;  %v860_v31 = vld [vmem:[#allocation2 + $0x169] sm:$0xff] }
  0x9b   :  { %v1018_v3 = vadd.f32 %v986_v16, %v921_v21  ;;  %v825_v15 = vadd.f32 %v793_v35, %v727_v28  ;;  %v213_v53 = vmul.f32 %v759_v60, %v1271_v25  ;;  %v503_v7 = vmul.f32 %v760_v0, %v1322_v43  ;;  %v957_v19 = vld [vmem:[#allocation2 + $0x16a] sm:$0xff] }
  0x9c   :  { %v631_v5 = vadd.f32 %v599_v58, %v534_v45  ;;  %v438_v36 = vadd.f32 %v406_v18, %v341_v34  ;;  %v310_v59 = vmul.f32 %v856_v4, %v1288_v29  ;;  %v891_v41 = vmul.f32 %v1335_v56, %v858_v48 }
  0x9d   :  { %1050 = vst.msk [vmem:[%s1809_s2 + $0xb0] sm:$0xff] %vm33_vm0, %v1018_v3  ;;  %v922_v52 = vadd.f32 %v890_v26, %v825_v15  ;;  %v988_v14 = vmul.f32 %v1341_v62, %v1697_v50  ;;  %v600_v2 = vmul.f32 %v857_v12, %v1325_v47  ;;  %v407_v4 = vmul.f32 %v1664_v51, %v1305_v33 }
  0x9e   :  { %v728_v60 = vadd.f32 %v696_v46, %v631_v5  ;;  %v535_v61 = vadd.f32 %v503_v7, %v438_v36  ;;  %v342_v6 = vadd.f32 %v310_v59, %v213_v53  ;;  %v697_v1 = vmul.f32 %v954_v22, %v1328_v49  ;;  %v958_v36 = vld [vmem:[#allocation2 + $0x172] sm:$0xff] }
  0x9f   :  { %v1019_v57 = vadd.f32 %v987_v27, %v922_v52  ;;  %v504_v10 = vmul.f32 %v761_v37, %v1322_v43  ;;  %v214_v55 = vmul.f32 %v760_v0, %v1271_v25  ;;  %v311_v30 = vmul.f32 %v857_v12, %v1288_v29  ;;  %v764_v27 = vld [vmem:[#allocation2 + $0x170] sm:$0xff] }
  0xa0   :  { %v826_v16 = vadd.f32 %v794_v42, %v728_v60  ;;  %v632_v17 = vadd.f32 %v600_v2, %v535_v61  ;;  %v439_v11 = vadd.f32 %v407_v4, %v342_v6  ;;  %v795_v51 = vmul.f32 %v1332_v54, %v762_v8  ;;  %v861_v42 = vld [vmem:[#allocation2 + $0x171] sm:$0xff]  ;;  %v765_v6 = vld [vmem:[#allocation2 + $0x180] sm:$0xff] }
  0xa1   :  { %1051 = vst.msk [vmem:[%s1809_s2 + $0xb8] sm:$0xff] %vm33_vm0, %v1019_v57  ;;  %v892_v63 = vmul.f32 %v1335_v56, %v859_v13  ;;  %v601_v32 = vmul.f32 %v858_v48, %v1325_v47  ;;  %v408_v35 = vmul.f32 %v954_v22, %v1305_v33  ;;  %v343_v12 = vadd.f32 %v311_v30, %v214_v55 }
  0xa2   :  { %v923_v0 = vadd.f32 %v891_v41, %v826_v16  ;;  %v729_v38 = vadd.f32 %v697_v1, %v632_v17  ;;  %v536_v23 = vadd.f32 %v504_v10, %v439_v11  ;;  %v989_v44 = vmul.f32 %v1341_v62, %v956_v20  ;;  %v862_v16 = vld [vmem:[#allocation2 + $0x181] sm:$0xff] }
  0xa3   :  { %v698_v26 = vmul.f32 %v1697_v50, %v1328_v49  ;;  %v505_v39 = vmul.f32 %v762_v8, %v1322_v43  ;;  %v215_v40 = vmul.f32 %v761_v37, %v1271_v25  ;;  %v440_v22 = vadd.f32 %v408_v35, %v343_v12  ;;  %v959_v35 = vld [vmem:[#allocation2 + $0x182] sm:$0xff] }
  0xa4   :  { %v1020_v24 = vadd.f32 %v988_v14, %v923_v0  ;;  %v827_v21 = vadd.f32 %v795_v51, %v729_v38  ;;  %v633_v28 = vadd.f32 %v601_v32, %v536_v23  ;;  %v796_v58 = vmul.f32 %v1332_v54, %v763_v9 }
  0xa5   :  { %v893_v45 = vmul.f32 %v1335_v56, %v860_v31  ;;  %v990_v46 = vmul.f32 %v1341_v62, %v957_v19  ;;  %v312_v34 = vmul.f32 %v858_v48, %v1288_v29  ;;  %v537_v3 = vadd.f32 %v505_v39, %v440_v22 }
  0xa6   :  { %1052 = vst.msk [vmem:[%s1809_s2 + $0xc0] sm:$0xff] %vm33_vm0, %v1020_v24  ;;  %v924_v18 = vadd.f32 %v892_v63, %v827_v21  ;;  %v730_v37 = vadd.f32 %v698_v26, %v633_v28  ;;  %v602_v15 = vmul.f32 %v859_v13, %v1325_v47  ;;  %v699_v53 = vmul.f32 %v956_v20, %v1328_v49 }
  0xa7   :  { %v797_v5 = vmul.f32 %v1332_v54, %v764_v27  ;;  %v344_v7 = vadd.f32 %v312_v34, %v215_v40  ;;  %v409_v48 = vmul.f32 %v1697_v50, %v1305_v33  ;;  %v216_v14 = vmul.f32 %v762_v8, %v1271_v25  ;;  %v766_v40 = vld [vmem:[#allocation2 + $0x188] sm:$0xff] }
  0xa8   :  { %v1021_v59 = vadd.f32 %v989_v44, %v924_v18  ;;  %v828_v52 = vadd.f32 %v796_v58, %v730_v37  ;;  %v634_v41 = vadd.f32 %v602_v15, %v537_v3  ;;  %v894_v2 = vmul.f32 %v1335_v56, %v861_v42  ;;  %v863_v34 = vld [vmem:[#allocation2 + $0x189] sm:$0xff]  ;;  %v767_v37 = vld [vmem:[#allocation2 + $0x198] sm:$0xff] }
  0xa9   :  { %v441_v60 = vadd.f32 %v409_v48, %v344_v7  ;;  %v506_v61 = vmul.f32 %v763_v9, %v1322_v43  ;;  %v313_v4 = vmul.f32 %v859_v13, %v1288_v29  ;;  %v991_v1 = vmul.f32 %v1341_v62, %v958_v36  ;;  %v960_v7 = vld [vmem:[#allocation2 + $0x18a] sm:$0xff] }
  0xaa   :  { %1053 = vst.msk [vmem:[%s1809_s2 + $0xc8] sm:$0xff] %vm33_vm0, %v1021_v59  ;;  %v925_v57 = vadd.f32 %v893_v45, %v828_v52  ;;  %v731_v50 = vadd.f32 %v699_v53, %v634_v41  ;;  %v603_v10 = vmul.f32 %v860_v31, %v1325_v47  ;;  %v700_v55 = vmul.f32 %v957_v19, %v1328_v49 }
  0xab   :  { %v538_v8 = vadd.f32 %v506_v61, %v441_v60  ;;  %v345_v17 = vadd.f32 %v313_v4, %v216_v14  ;;  %v410_v11 = vmul.f32 %v956_v20, %v1305_v33  ;;  %v798_v51 = vmul.f32 %v1332_v54, %v765_v6  ;;  %v864_v60 = vld [vmem:[#allocation2 + $0x199] sm:$0xff] }
  0xac   :  { %v1022_v30 = vadd.f32 %v990_v46, %v925_v57  ;;  %v829_v13 = vadd.f32 %v797_v5, %v731_v50  ;;  %v217_v63 = vmul.f32 %v763_v9, %v1271_v25  ;;  %v507_v38 = vmul.f32 %v764_v27, %v1322_v43 }
  0xad   :  { %v635_v32 = vadd.f32 %v603_v10, %v538_v8  ;;  %v442_v0 = vadd.f32 %v410_v11, %v345_v17  ;;  %v314_v23 = vmul.f32 %v860_v31, %v1288_v29  ;;  %v895_v20 = vmul.f32 %v1335_v56, %v862_v16  ;;  %v865_v11 = vld [vmem:[#allocation2 + $0x1a1] sm:$0xff] }
  0xae   :  { %1054 = vst.msk [vmem:[%s1809_s2 + $0xd0] sm:$0xff] %vm33_vm0, %v1022_v30  ;;  %v926_v12 = vadd.f32 %v894_v2, %v829_v13  ;;  %v604_v44 = vmul.f32 %v861_v42, %v1325_v47  ;;  %v411_v26 = vmul.f32 %v957_v19, %v1305_v33  ;;  %v508_v21 = vmul.f32 %v765_v6, %v1322_v43 }
  0xaf   :  { %v732_v9 = vadd.f32 %v700_v55, %v635_v32  ;;  %v539_v39 = vadd.f32 %v507_v38, %v442_v0  ;;  %v346_v24 = vadd.f32 %v314_v23, %v217_v63  ;;  %v992_v31 = vmul.f32 %v1341_v62, %v959_v35 }
  0xb0   :  { %v1023_v28 = vadd.f32 %v991_v1, %v926_v12  ;;  %v701_v22 = vmul.f32 %v958_v36, %v1328_v49  ;;  %v218_v58 = vmul.f32 %v764_v27, %v1271_v25  ;;  %v315_v19 = vmul.f32 %v861_v42, %v1288_v29  ;;  %v961_v1 = vld [vmem:[#allocation2 + $0x19a] sm:$0xff] }
  0xb1   :  { %v830_v45 = vadd.f32 %v798_v51, %v732_v9  ;;  %v636_v46 = vadd.f32 %v604_v44, %v539_v39  ;;  %v443_v18 = vadd.f32 %v411_v26, %v346_v24  ;;  %v799_v3 = vmul.f32 %v1332_v54, %v766_v40  ;;  %v962_v51 = vld [vmem:[#allocation2 + $0x1a2] sm:$0xff] }
  0xb2   :  { %1055 = vst.msk [vmem:[%s1809_s2 + $0xd8] sm:$0xff] %vm33_vm0, %v1023_v28  ;;  %v605_v15 = vmul.f32 %v862_v16, %v1325_v47  ;;  %v412_v53 = vmul.f32 %v958_v36, %v1305_v33  ;;  %v509_v25 = vmul.f32 %v766_v40, %v1322_v43  ;;  %v347_v59 = vadd.f32 %v315_v19, %v218_v58  ;;  %v768_v36 = vld [vmem:[#allocation2 + $0x1a0] sm:$0xff] }
  0xb3   :  { %v927_v27 = vadd.f32 %v895_v20, %v830_v45  ;;  %v733_v5 = vadd.f32 %v701_v22, %v636_v46  ;;  %v540_v48 = vadd.f32 %v508_v21, %v443_v18  ;;  %v896_v29 = vmul.f32 %v1335_v56, %v863_v34 }
  0xb4   :  { %v702_v42 = vmul.f32 %v959_v35, %v1328_v49  ;;  %v800_v52 = vmul.f32 %v1332_v54, %v767_v37  ;;  %v444_v61 = vadd.f32 %v412_v53, %v347_v59  ;;  %v993_v33 = vmul.f32 %v1341_v62, %v960_v7 }
  0xb5   :  { %v1024_v41 = vadd.f32 %v992_v31, %v927_v27  ;;  %v831_v14 = vadd.f32 %v799_v3, %v733_v5  ;;  %v637_v2 = vadd.f32 %v605_v15, %v540_v48  ;;  %v606_v57 = vmul.f32 %v863_v34, %v1325_v47 }
  0xb6   :  { %v541_v4 = vadd.f32 %v509_v25, %v444_v61  ;;  %v897_v50 = vmul.f32 %v1335_v56, %v864_v60  ;;  %v703_v10 = vmul.f32 %v960_v7, %v1328_v49  ;;  %v801_v17 = vmul.f32 %v1332_v54, %v768_v36 }
  0xb7   :  { %1056 = vst.msk [vmem:[%s1809_s2 + $0xe0] sm:$0xff] %vm33_vm0, %v1024_v41  ;;  %v928_v43 = vadd.f32 %v896_v29, %v831_v14  ;;  %v734_v6 = vadd.f32 %v702_v42, %v637_v2  ;;  %v994_v13 = vmul.f32 %v1341_v62, %v961_v1  ;;  %v898_v49 = vmul.f32 %v1335_v56, %v865_v11 }
  0xb8   :  { %v638_v16 = vadd.f32 %v606_v57, %v541_v4  ;;  %v995_v35 = vmul.f32 %v1341_v62, %v962_v51 }
  0xb9   :  { %v1025_v8 = vadd.f32 %v993_v33, %v928_v43  ;;  %v832_v55 = vadd.f32 %v800_v52, %v734_v6 }
  0xba   :  { %v735_v47 = vadd.f32 %v703_v10, %v638_v16 }
  0xbb   :  { %1057 = vst.msk [vmem:[%s1809_s2 + $0xe8] sm:$0xff] %vm33_vm0, %v1025_v8  ;;  %v929_v30 = vadd.f32 %v897_v50, %v832_v55 }
  0xbc   :  { %v833_v32 = vadd.f32 %v801_v17, %v735_v47 }
  0xbd   :  { %v1026_v63 = vadd.f32 %v994_v13, %v929_v30 }
  0xbe   :  { %v930_v54 = vadd.f32 %v898_v49, %v833_v32 }
  0xbf   :  { %1058 = vst.msk [vmem:[%s1809_s2 + $0xf0] sm:$0xff] %vm33_vm0, %v1026_v63 }
  0xc0   :  { %v1027_v0 = vadd.f32 %v995_v35, %v930_v54 }
  0xc2   :  { %1059 = vst.msk [vmem:[%s1809_s2 + $0xf8] sm:$0xff] %vm33_vm0, %v1027_v0 }
  0xc3   :  { %1064 = vsyncpa [#allocation4], 1 }

</bundles_post_ra>
